<compile_context>
chip_gen: v7x
topology: tpu7x:2x2x1
jax: 0.10.0
libtpu: 0.0.40
codegen_flags: <defaults>
</compile_context>

<pallas_src>
import jax
import jax.numpy as jnp
from jax.experimental import pallas as pl
from jax.experimental.pallas import tpu as pltpu


def _round_up(n, m):
    return ((n + m - 1) // m) * m


def _two_head_kernel(x_ref, w1_ref, b1_ref, w2_ref, b2_ref, o1_ref, o2_ref):
    # x: (TB, 128); w1: (128, d1); b1: (1, d1); w2: (128, d2); b2: (1, d2)
    x = x_ref[...]
    y1 = jnp.dot(x, w1_ref[...], preferred_element_type=jnp.float32)
    y2 = jnp.dot(x, w2_ref[...], preferred_element_type=jnp.float32)
    o1_ref[...] = (y1 + b1_ref[...]).astype(o1_ref.dtype)
    o2_ref[...] = (y2 + b2_ref[...]).astype(o2_ref.dtype)


def multiobjective_forward(audio_x, w1, b1, w2, b2, *, batch_tile=4096):
    """audio_x: (B, 128); w1: (128, d1); b1: (d1,); w2: (128, d2); b2: (d2,).

    Returns (audio_x @ w1 + b1, audio_x @ w2 + b2) — same semantics as the two
    nn.Linear heads of the PyTorch module (weights stored pre-transposed).
    """
    B, D = audio_x.shape
    d1 = w1.shape[1]
    d2 = w2.shape[1]
    b1r = b1.reshape(1, d1)
    b2r = b2.reshape(1, d2)
    out_shapes = (
        jax.ShapeDtypeStruct((B, d1), audio_x.dtype),
        jax.ShapeDtypeStruct((B, d2), audio_x.dtype),
    )

    if B <= batch_tile:
        # Small / medium batch: no grid, no pipelining machinery — whole arrays
        # live in VMEM for the duration of the (single) kernel invocation.
        vmem = pl.BlockSpec(memory_space=pltpu.MemorySpace.VMEM)
        out1, out2 = pl.pallas_call(
            _two_head_kernel,
            out_shape=out_shapes,
            in_specs=[vmem] * 5,
            out_specs=(vmem, vmem),
        )(audio_x, w1, b1r, w2, b2r)
        return out1, out2

    # Large batch: tile over B; weights / biases stay VMEM-resident via a
    # constant index_map.  Tile size:
    #   * rounded to a multiple of 8 (sublane alignment of the BlockSpec),
    #   * never larger than needed for >= 2 balanced tiles, so the "parallel"
    #     batch axis can shard across both TensorCores on v7x,
    #   * capped at batch_tile (default 4096 keeps double-buffered tiles well
    #     inside the default scoped-VMEM limit on v5e/v6e/v7x).
    TB = min(_round_up(batch_tile, 8), _round_up(pl.cdiv(B, 2), 8))
    n_tiles = pl.cdiv(B, TB)  # ragged last block handled by Pallas masking

    out1, out2 = pl.pallas_call(
        _two_head_kernel,
        out_shape=out_shapes,
        grid=(n_tiles,),
        in_specs=[
            pl.BlockSpec((TB, D), lambda i: (i, 0)),
            pl.BlockSpec((D, d1), lambda i: (0, 0)),
            pl.BlockSpec((1, d1), lambda i: (0, 0)),
            pl.BlockSpec((D, d2), lambda i: (0, 0)),
            pl.BlockSpec((1, d2), lambda i: (0, 0)),
        ],
        out_specs=(
            pl.BlockSpec((TB, d1), lambda i: (i, 0)),
            pl.BlockSpec((TB, d2), lambda i: (i, 0)),
        ),
        compiler_params=pltpu.CompilerParams(
            dimension_semantics=("parallel",)),
    )(audio_x, w1, b1r, w2, b2r)
    return out1, out2


def init_params(key, d_in, d_out_1, d_out_2, dtype=jnp.float32):
    """Deterministic init mimicking torch.nn.Linear default (uniform ±1/sqrt(d_in)).
    Weights stored as (d_in, d_out) == torch weight.T so the kernel matmul is
    exactly y = x @ W.T + b."""
    k1, k2, k3, k4 = jax.random.split(key, 4)
    bound = 1.0 / jnp.sqrt(float(d_in))
    w1 = jax.random.uniform(k1, (d_in, d_out_1), dtype, -bound, bound)
    b1 = jax.random.uniform(k2, (d_out_1,), dtype, -bound, bound)
    w2 = jax.random.uniform(k3, (d_in, d_out_2), dtype, -bound, bound)
    b2 = jax.random.uniform(k4, (d_out_2,), dtype, -bound, bound)
    return w1, b1, w2, b2


if __name__ == "__main__":
    key = jax.random.PRNGKey(0)
    kx, kp, kx2 = jax.random.split(key, 3)

    D_IN = 128                 # forward implies a 128-dim input feature
    D_OUT_1, D_OUT_2 = 32, 16
    w1, b1, w2, b2 = init_params(kp, D_IN, D_OUT_1, D_OUT_2)

    # --- Small batch: single grid-less whole-array-in-VMEM call ---
    B = 8
    audio_x = jax.random.normal(kx, (B, D_IN), jnp.float32)
    out1, out2 = multiobjective_forward(audio_x, w1, b1, w2, b2)
    jax.block_until_ready((out1, out2))

    ref1 = audio_x @ w1 + b1
    ref2 = audio_x @ w2 + b2
    assert out1.shape == (B, D_OUT_1) and out2.shape == (B, D_OUT_2)
    assert jnp.allclose(out1, ref1, atol=1e-5, rtol=1e-5)
    assert jnp.allclose(out2, ref2, atol=1e-5, rtol=1e-5)

    # --- Larger batch with a small tile override: exercises the grid path,
    #     the v7x >=2-balanced-tiles logic, and the ragged (masked) last block
    #     without any host-side pad / slice. ---
    B2 = 300
    audio_x2 = jax.random.normal(kx2, (B2, D_IN), jnp.float32)
    o1b, o2b = multiobjective_forward(audio_x2, w1, b1, w2, b2, batch_tile=128)
    jax.block_until_ready((o1b, o2b))

    ref1b = audio_x2 @ w1 + b1
    ref2b = audio_x2 @ w2 + b2
    assert o1b.shape == (B2, D_OUT_1) and o2b.shape == (B2, D_OUT_2)
    assert jnp.allclose(o1b, ref1b, atol=1e-5, rtol=1e-5)
    assert jnp.allclose(o2b, ref2b, atol=1e-5, rtol=1e-5)

    print("KERNEL_OK")
</pallas_src>

<mosaic_0001>
module attributes {stable_mosaic.version = 11 : i64} {
  func.func @_two_head_kernel(%arg0: memref<8x128xf32, #tpu.memory_space<vmem>>, %arg1: memref<128x32xf32, #tpu.memory_space<vmem>>, %arg2: memref<1x32xf32, #tpu.memory_space<vmem>>, %arg3: memref<128x16xf32, #tpu.memory_space<vmem>>, %arg4: memref<1x16xf32, #tpu.memory_space<vmem>>, %arg5: memref<8x32xf32, #tpu.memory_space<vmem>>, %arg6: memref<8x16xf32, #tpu.memory_space<vmem>>) attributes {dimension_semantics = [], scalar_prefetch = 0 : i64, scratch_operands = 0 : i64, tpu.core_type = #tpu.core_type<tc>} {
    %c0 = arith.constant 0 : index
    %c0_0 = arith.constant 0 : index
    %0 = vector.load %arg0[%c0, %c0_0] : memref<8x128xf32, #tpu.memory_space<vmem>>, vector<8x128xf32>
    %c0_1 = arith.constant 0 : index
    %c0_2 = arith.constant 0 : index
    %1 = vector.load %arg1[%c0_1, %c0_2] : memref<128x32xf32, #tpu.memory_space<vmem>>, vector<128x32xf32>
    %cst = arith.constant dense<0.000000e+00> : vector<8x32xf32>
    %2 = tpu.matmul %0, %1, %cst {dimension_numbers = #tpu.dot_dimension_numbers<[1], [0], [0], [1], [0, 0, 1, 1], [], []>} : vector<8x128xf32>, vector<128x32xf32>, vector<8x32xf32> -> vector<8x32xf32>
    %c0_3 = arith.constant 0 : index
    %c0_4 = arith.constant 0 : index
    %3 = vector.load %arg3[%c0_3, %c0_4] : memref<128x16xf32, #tpu.memory_space<vmem>>, vector<128x16xf32>
    %cst_5 = arith.constant dense<0.000000e+00> : vector<8x16xf32>
    %4 = tpu.matmul %0, %3, %cst_5 {dimension_numbers = #tpu.dot_dimension_numbers<[1], [0], [0], [1], [0, 0, 1, 1], [], []>} : vector<8x128xf32>, vector<128x16xf32>, vector<8x16xf32> -> vector<8x16xf32>
    %c0_6 = arith.constant 0 : index
    %c0_7 = arith.constant 0 : index
    %5 = vector.load %arg2[%c0_6, %c0_7] : memref<1x32xf32, #tpu.memory_space<vmem>>, vector<1x32xf32>
    %6 = vector.broadcast %5 : vector<1x32xf32> to vector<8x32xf32>
    %7 = arith.addf %2, %6 : vector<8x32xf32>
    %c0_8 = arith.constant 0 : index
    %c0_9 = arith.constant 0 : index
    %8 = vector.load %arg5[%c0_8, %c0_9] : memref<8x32xf32, #tpu.memory_space<vmem>>, vector<8x32xf32>
    tpu.vector_store %arg5[%c0_8, %c0_9], %7 {strides = array<i32>} : memref<8x32xf32, #tpu.memory_space<vmem>>, vector<8x32xf32>,
    %c0_10 = arith.constant 0 : index
    %c0_11 = arith.constant 0 : index
    %9 = vector.load %arg4[%c0_10, %c0_11] : memref<1x16xf32, #tpu.memory_space<vmem>>, vector<1x16xf32>
    %10 = vector.broadcast %9 : vector<1x16xf32> to vector<8x16xf32>
    %11 = arith.addf %4, %10 : vector<8x16xf32>
    %c0_12 = arith.constant 0 : index
    %c0_13 = arith.constant 0 : index
    %12 = vector.load %arg6[%c0_12, %c0_13] : memref<8x16xf32, #tpu.memory_space<vmem>>, vector<8x16xf32>
    tpu.vector_store %arg6[%c0_12, %c0_13], %11 {strides = array<i32>} : memref<8x16xf32, #tpu.memory_space<vmem>>, vector<8x16xf32>,
    return
  }
}

</mosaic_0001>

<bundles_post_ra>
// kernel: tpu_custom_call.1
= control target key start
LH: loop header
LB: loop body
LE: loop exit
PB: predicated region body
PF: predicated region fallthrough
CT: control target
= control target key end

     0   :  { %12 = vsyncpa [#allocation3], 0  ;;  %v450_v3 = vmov 0.0|0.0   ;;  %vm451_vm0 = vmmov 0   ;;  %v452_v11 = vmov 0.0   ;;  %s636_s0 = inlined_call_operand.vmem [shape: f32[8,128], index: 0, kind: input, shape index: {}]   ;;  %s637_s1 = inlined_call_operand.vmem [shape: f32[128,32], index: 1, kind: input, shape index: {}]   ;;  %s638_s2 = inlined_call_operand.vmem [shape: f32[1,32], index: 2, kind: input, shape index: {}]   ;;  %s639_s3 = inlined_call_operand.vmem [shape: f32[128,16], index: 3, kind: input, shape index: {}]   ;;  %s640_s4 = inlined_call_operand.vmem [shape: f32[1,16], index: 4, kind: input, shape index: {}]   ;;  %s641_s5 = inlined_call_operand.hbm [shape: f32[8,32], index: 5, kind: output, shape index: {0}]   ;;  %s642_s6 = inlined_call_operand.hbm [shape: f32[8,16], index: 6, kind: output, shape index: {1}]  }
   0x1   :  { %v25_v0 = vld [vmem:[%s637_s1] sm:$0xff]  ;;  %v26_v1 = vld [vmem:[%s637_s1 + $0x8] sm:$0xff]  ;;  %349 = vmatprep.subr.bf16.mxu0 %v450_v3  ;;  %373 = vmatprep.subr.bf16.mxu1 %v450_v3  ;;  %v27_v6 = vld [vmem:[%s637_s1 + $0x10] sm:$0xff] }
   0x2   :  { %v41_v2 = vld [vmem:[%s639_s3] sm:$0xff]  ;;  %v350_v4 = vpack.c.bf16 %v26_v1, %v25_v0  ;;  %v42_v5 = vld [vmem:[%s639_s3 + $0x8] sm:$0xff]  ;;  %v28_v7 = vld [vmem:[%s637_s1 + $0x18] sm:$0xff]  ;;  %311 = vmatprep.mubr.msk.f32.mxu0 %vm451_vm0, %v452_v11  ;;  %346 = vmatprep.mubr.msk.f32.mxu1 %vm451_vm0, %v452_v11 }
   0x3   :  { %v374_v8 = vpack.c.bf16 %v42_v5, %v41_v2  ;;  %v43_v9 = vld [vmem:[%s639_s3 + $0x10] sm:$0xff]  ;;  %v44_v10 = vld [vmem:[%s639_s3 + $0x18] sm:$0xff]  ;;  %v353_v12 = vpack.c.bf16 %v28_v7, %v27_v6  ;;  %v29_v14 = vld [vmem:[%s637_s1 + $0x20] sm:$0xff] }
   0x4   :  { %351 = vmatpush3.bf16.msra.mxu0 %v350_v4  ;;  %v377_v13 = vpack.c.bf16 %v44_v10, %v43_v9  ;;  %v30_v15 = vld [vmem:[%s637_s1 + $0x28] sm:$0xff]  ;;  %v45_v16 = vld [vmem:[%s639_s3 + $0x20] sm:$0xff]  ;;  %v31_v20 = vld [vmem:[%s637_s1 + $0x30] sm:$0xff] }
   0x5   :  { %375 = vmatpush3.bf16.msra.mxu1 %v374_v8  ;;  %352 = vmatprep.subr.bf16.mxu0 %v450_v3  ;;  %v46_v17 = vld [vmem:[%s639_s3 + $0x28] sm:$0xff]  ;;  %v356_v18 = vpack.c.bf16 %v30_v15, %v29_v14  ;;  %v32_v21 = vld [vmem:[%s637_s1 + $0x38] sm:$0xff]  ;;  %v47_v22 = vld [vmem:[%s639_s3 + $0x30] sm:$0xff] }
   0x6   :  { %376 = vmatprep.subr.bf16.mxu1 %v450_v3  ;;  %v380_v19 = vpack.c.bf16 %v46_v17, %v45_v16  ;;  %v48_v23 = vld [vmem:[%s639_s3 + $0x38] sm:$0xff]  ;;  %v359_v24 = vpack.c.bf16 %v32_v21, %v31_v20 }
   0x8   :  { %354 = vmatpush3.bf16.msra.mxu0 %v353_v12 }
   0x9   :  { %378 = vmatpush3.bf16.msra.mxu1 %v377_v13  ;;  %355 = vmatprep.subr.bf16.mxu0 %v450_v3 }
   0xa   :  { %379 = vmatprep.subr.bf16.mxu1 %v450_v3 }
   0xc   :  { %357 = vmatpush3.bf16.msra.mxu0 %v356_v18 }
   0xd   :  { %13 = vsyncpa [#allocation5], 0  ;;  %381 = vmatpush3.bf16.msra.mxu1 %v380_v19  ;;  %358 = vmatprep.subr.bf16.mxu0 %v450_v3  ;;  %v383_v25 = vpack.c.bf16 %v48_v23, %v47_v22  ;;  %v33_v26 = vld [vmem:[%s637_s1 + $0x40] sm:$0xff]  ;;  %v34_v27 = vld [vmem:[%s637_s1 + $0x48] sm:$0xff]  ;;  %s454_s19 = smov [#allocation4]   ;;  %vm134_vm1 = vcmask 261120  }
   0xe   :  { %382 = vmatprep.subr.bf16.mxu1 %v450_v3  ;;  %v49_v28 = vld [vmem:[%s639_s3 + $0x40] sm:$0xff]  ;;  %v50_v29 = vld [vmem:[%s639_s3 + $0x48] sm:$0xff]  ;;  %v362_v30 = vpack.c.bf16 %v34_v27, %v33_v26  ;;  %v35_v32 = vld [vmem:[%s637_s1 + $0x50] sm:$0xff]  ;;  %s231_s20 = sshll.u32 %s454_s19, 4  ;;  %vm213_vm2 = vcmask 130048   ;;  %s232_s20 = int_to_ptr.vmem [resolvable:$true] %s231_s20 }
   0xf   :  { %v386_v31 = vpack.c.bf16 %v50_v29, %v49_v28  ;;  %v36_v33 = vld [vmem:[%s637_s1 + $0x58] sm:$0xff]  ;;  %v51_v34 = vld [vmem:[%s639_s3 + $0x50] sm:$0xff]  ;;  %v37_v38 = vld [vmem:[%s637_s1 + $0x60] sm:$0xff] }
  0x10   :  { %360 = vmatpush3.bf16.msra.mxu0 %v359_v24  ;;  %v52_v35 = vld [vmem:[%s639_s3 + $0x58] sm:$0xff]  ;;  %v365_v36 = vpack.c.bf16 %v36_v33, %v35_v32  ;;  %v38_v39 = vld [vmem:[%s637_s1 + $0x68] sm:$0xff]  ;;  %v53_v40 = vld [vmem:[%s639_s3 + $0x60] sm:$0xff] }
  0x11   :  { %384 = vmatpush3.bf16.msra.mxu1 %v383_v25  ;;  %361 = vmatprep.subr.bf16.mxu0 %v450_v3  ;;  %v389_v37 = vpack.c.bf16 %v52_v35, %v51_v34  ;;  %v54_v41 = vld [vmem:[%s639_s3 + $0x68] sm:$0xff]  ;;  %v368_v42 = vpack.c.bf16 %v38_v39, %v37_v38  ;;  %v39_v44 = vld [vmem:[%s637_s1 + $0x70] sm:$0xff]  ;;  %v40_v45 = vld [vmem:[%s637_s1 + $0x78] sm:$0xff] }
  0x12   :  { %385 = vmatprep.subr.bf16.mxu1 %v450_v3  ;;  %v392_v43 = vpack.c.bf16 %v54_v41, %v53_v40  ;;  %v55_v46 = vld [vmem:[%s639_s3 + $0x70] sm:$0xff]  ;;  %v56_v47 = vld [vmem:[%s639_s3 + $0x78] sm:$0xff]  ;;  %v371_v48 = vpack.c.bf16 %v40_v45, %v39_v44  ;;  %v24_v50 = vld [vmem:[%s636_s0] sm:$0xff]  ;;  %s453_s3 = smov [#allocation2]  }
  0x13   :  { %v395_v49 = vpack.c.bf16 %v56_v47, %v55_v46  ;;  %v243_v51 = vld [vmem:[%s638_s2] ss:$0 sm:$0xff]  ;;  %s221_s16 = sshll.u32 %s453_s3, 4  ;;  %s222_s16 = int_to_ptr.vmem [resolvable:$true] %s221_s16 }
  0x14   :  { %363 = vmatpush3.bf16.msra.mxu0 %v362_v30  ;;  %v244_v52 = vld [vmem:[%s640_s4] ss:$0 sm:$0xff]  ;;  %s402_s0 = scalar_lea.vmem %s222_s16, 128  ;;  %p407_p1 = scmp.lt.s32.totalorder %s222_s16, %s222_s16 }
  0x15   :  { %387 = vmatpush3.bf16.msra.mxu1 %v386_v31  ;;  %364 = vmatprep.subr.bf16.mxu0 %v450_v3  ;;  %p403_p0 = scmp.ne.s32.totalorder %s222_s16, %s402_s0  ;;  %p408_p2 = scmp.lt.s32.totalorder %s402_s0, %s402_s0 }
  0x16   :  { %388 = vmatprep.subr.bf16.mxu1 %v450_v3 }
  0x17   :  { %p409_p3 = por %p408_p2, %p407_p1 }
  0x18   :  { %366 = vmatpush3.bf16.msra.mxu0 %v365_v36 }
  0x19   :  { %390 = vmatpush3.bf16.msra.mxu1 %v389_v37  ;;  %367 = vmatprep.subr.bf16.mxu0 %v450_v3  ;;  %p410_p4 = pnand %p409_p3, %p403_p0 }
  0x1a   :  { %391 = vmatprep.subr.bf16.mxu1 %v450_v3 }
  0x1c   :  { %369 = vmatpush3.bf16.msra.mxu0 %v368_v42 }
  0x1d   :  { %393 = vmatpush3.bf16.msra.mxu1 %v392_v43  ;;  %370 = vmatprep.subr.bf16.mxu0 %v450_v3 }
  0x1e   :  { %394 = vmatprep.subr.bf16.mxu1 %v450_v3 }
  0x20   :  { %372 = vmatpush3.bf16.msra.mxu0 %v371_v48 }
  0x21   :  { %396 = vmatpush3.bf16.msra.mxu1 %v395_v49 }
  0x23   :  { %312 = vmatmul.mubr.f32.vlgmr.msra.gmra.mrb[0].mxu0 %v24_v50 }
  0x24   :  { %347 = vmatmul.mubr.f32.vlgmr.msra.gmra.mrb[0].mxu1 %v24_v50 }
  0xf6   :  { %v130_v53 = vpop.f32.mrb[0].mxu0 }
  0xf7   :  { %v131_v54 = vadd.f32 %v243_v51, %v130_v53  ;;  %v209_v55 = vpop.f32.mrb[0].mxu1  ;;  %v313_v56 = vpop.f32.mrb[1].mxu0 }
  0xf8   :  { %v210_v57 = vadd.f32 %v244_v52, %v209_v55  ;;  %v348_v58 = vpop.f32.mrb[1].mxu1 }
  0xf9   :  { %135 = vst.msk [vmem:[#allocation2] sm:$0xff] %vm134_vm1, %v131_v54 }
  0xfa   :  { %413 = shalt.err (!%p410_p4)
}
  0xfb   :  { %s414_s21 = scalar_lea.hbm %s641_s5, 128 }
  0xfc   :  { %p415_p5 = scmp.ne.s32.totalorder %s641_s5, %s414_s21  ;;  %p418_p6 = scmp.lt.u32.totalorder %s414_s21, %s641_s5 }
  0xfe   :  { %p420_p7 = pnand %p418_p6, %p415_p5 }
 0x100   :  { %423 = shalt.err (!%p420_p7)
}
 0x101   :  { %224 = dma.vmem_to_hbm [thread:$0]  %s222_s16, 128, %s641_s5, [#allocation3]   ;;  %214 = vst.msk [vmem:[#allocation4] sm:$0xff] %vm213_vm2, %v210_v57 }
 0x102   :  { %s424_s28 = scalar_lea.vmem %s232_s20, 128  ;;  %p429_p9 = scmp.lt.s32.totalorder %s232_s20, %s232_s20 }
 0x103   :  { %p425_p8 = scmp.ne.s32.totalorder %s232_s20, %s424_s28  ;;  %p430_p10 = scmp.lt.s32.totalorder %s424_s28, %s424_s28 }
 0x105   :  { %p431_p11 = por %p430_p10, %p429_p9 }
 0x107   :  { %p432_p12 = pnand %p431_p11, %p425_p8 }
 0x109   :  { %435 = shalt.err (!%p432_p12)
}
 0x10a   :  { %s436_s7 = scalar_lea.hbm %s642_s6, 128 }
 0x10b   :  { %p437_p13 = scmp.ne.s32.totalorder %s642_s6, %s436_s7  ;;  %p440_p0 = scmp.lt.u32.totalorder %s436_s7, %s642_s6 }
 0x10d   :  { %p442_p1 = pnand %p440_p0, %p437_p13 }
 0x10f   :  { %445 = shalt.err (!%p442_p1)
}
 0x110   :  { %234 = dma.vmem_to_hbm [thread:$0]  %s232_s20, 128, %s642_s6, [#allocation5]  }
 0x111   :  { %446 = dma.done.wait [#allocation3], 128  }
 0x112   :  { %447 = vsyncadd [#allocation3], 4294967168 }
 0x113   :  { %448 = dma.done.wait [#allocation5], 128  }
 0x114   :  { %449 = vsyncadd [#allocation5], 4294967168 }
 0x115   :  { %241 = vsyncpa [#allocation3], 1 }
 0x116   :  { %242 = vsyncpa [#allocation5], 1 }

</bundles_post_ra>
